<compile_context>
chip_gen: v7x
topology: tpu7x:2x2x1
jax: 0.10.0
libtpu: 0.0.40
codegen_flags: <defaults>
</compile_context>

<pallas_src>
import functools

import jax
import jax.numpy as jnp
import numpy as np
from jax.experimental import pallas as pl
from jax.experimental.pallas import tpu as pltpu


def _round_up(x: int, m: int) -> int:
    return (x + m - 1) // m * m


def subgl_kernel(seq_ref, neigh_ref, temp_ref, out_ref, *, n_neigh, dim):
    # seq_ref   : (TM, D)    bf16   sequence-position embedding
    # neigh_ref : (TM, N*D)  bf16   neighbor embeddings, neighbor-major on lanes
    # temp_ref  : (TM, N)    f32    per-neighbor scalar weight (rel_w . softmax(beta))
    # out_ref   : (TM, D)    f32    L2-normalized cas_h
    temp = temp_ref[...]                                    # (TM, N)
    neigh = neigh_ref[...].astype(jnp.float32)              # upcast right after load
    cas = seq_ref[...].astype(jnp.float32)                  # (TM, D) f32 accumulator
    # SumAggregation of dropout(temp * neighbor_embed); dropout == identity (eval).
    for n in range(n_neigh):                                # N tiny & static -> unrolled
        cas = cas + temp[:, n:n + 1] * neigh[:, n * dim:(n + 1) * dim]
    # F.normalize(p=2, dim=feature): x / max(||x||_2, 1e-12)
    #   == x * rsqrt(max(||x||^2, 1e-24))  -> one EUP rsqrt + VPU multiply.
    sumsq = jnp.sum(cas * cas, axis=1, keepdims=True)       # (TM, 1)
    out_ref[...] = cas * jax.lax.rsqrt(jnp.maximum(sumsq, 1e-24))


def _choose_row_tile(M, per_row_bytes, *, requested_tm=2048,
                     vmem_tile_budget=32 << 20, min_steps=16):
    """Row-tile (sublane) size: big for HBM efficiency, capped by a VMEM budget."""
    tm = requested_tm
    # v7x has 2 TensorCores: keep >=16 grid steps so each core gets >=8 pipeline steps.
    if M >= min_steps * 128:
        tm = min(tm, _round_up(pl.cdiv(M, min_steps), 128))
    # v5e roofline: efficiency drops sharply below ~512-row tiles.
    tm = max(tm, 512)
    # Hard cap: double-buffered input+output tiles must fit the VMEM budget.
    vmem_cap = max(128, (vmem_tile_budget // (2 * per_row_bytes)) // 128 * 128)
    tm = min(tm, vmem_cap)
    # Never larger than the (128-padded) problem.
    tm = min(tm, _round_up(M, 128))
    return max(128, _round_up(tm, 128))


def subgl_forward(sequence, seq_neighbor, rel_neigh, uem, rem, weight_b,
                  *, requested_tm=2048, embed_dtype=jnp.bfloat16):
    B, L = sequence.shape
    N = seq_neighbor.shape[-1]
    D = uem.shape[1]
    R = rem.shape[1]
    M = B * L

    esz = np.dtype(embed_dtype).itemsize
    # HBM bytes per padded row: seq + neigh (embed dtype) + temp + out (f32).
    per_row_bytes = D * esz + N * D * esz + N * 4 + D * 4
    tm = _choose_row_tile(M, per_row_bytes, requested_tm=requested_tm)
    M_pad = _round_up(M, tm)
    pad = M_pad - M

    # --- glue (plain JAX): pad the *index* arrays (tiny), then gather ---
    flat_seq = sequence.reshape(M)
    flat_nei = seq_neighbor.reshape(M, N)
    flat_rel = rel_neigh.reshape(M, N)
    if pad:
        flat_seq = jnp.pad(flat_seq, (0, pad))                  # index 0 = padding row
        flat_nei = jnp.pad(flat_nei, ((0, pad), (0, 0)))
        flat_rel = jnp.pad(flat_rel, ((0, pad), (0, 0)))

    # bf16 transit for the large embedding tensors; kernel accumulates in f32.
    uem_t = uem.astype(embed_dtype)
    seq_embed = uem_t[flat_seq]                                 # (M_pad, D)
    neigh_embed = uem_t[flat_nei].reshape(M_pad, N * D)         # (M_pad, N*D), no transpose
    rel_w = rem[flat_rel].astype(jnp.float32)                   # (M_pad, N, R), tiny

    # Relation mixing done once in the wrapper (tiny): temp = rel_w @ softmax(beta).
    beta = jax.nn.softmax(weight_b.reshape(R).astype(jnp.float32))    # (R,)
    temp = jnp.einsum('mnr,r->mn', rel_w, beta)                 # (M_pad, N) f32

    kernel = functools.partial(subgl_kernel, n_neigh=N, dim=D)
    cost = pl.CostEstimate(
        flops=M_pad * D * (2 * N + 4),
        transcendentals=M_pad,
        bytes_accessed=M_pad * per_row_bytes,
    )

    out = pl.pallas_call(
        kernel,
        out_shape=jax.ShapeDtypeStruct((M_pad, D), jnp.float32),
        grid_spec=pl.GridSpec(
            grid=(M_pad // tm,),
            in_specs=[
                pl.BlockSpec((tm, D), lambda i: (i, 0)),        # seq tile
                pl.BlockSpec((tm, N * D), lambda i: (i, 0)),    # neighbor tile
                pl.BlockSpec((tm, N), lambda i: (i, 0)),        # temp tile
            ],
            out_specs=pl.BlockSpec((tm, D), lambda i: (i, 0)),
        ),
        compiler_params=pltpu.CompilerParams(
            dimension_semantics=("parallel",),
            vmem_limit_bytes=48 << 20,
        ),
        cost_estimate=cost,
    )(seq_embed, neigh_embed, temp)

    # Natural layout: just drop the padded rows; no output transpose round trip.
    return out[:M].reshape(B, L, D)


if __name__ == "__main__":
    key = jax.random.PRNGKey(0)
    B, L, N = 2, 8, 4          # batch, sequence length, neighbors per position
    D = 32                     # args.dim
    user_num = 32              # args.user_num
    R = 3                      # rela_num

    k1, k2, k3, k4, k5, k6 = jax.random.split(key, 6)

    # --- deterministic parameters ---
    uem = 0.1 * jax.random.normal(k1, (user_num, D), dtype=jnp.float32)
    uem = uem.at[0].set(0.0)                     # nn.Embedding padding_idx=0
    rem = jax.random.normal(k2, (R + 1, R), dtype=jnp.float32)
    rem = rem.at[0].set(0.0)                     # relation table, padding_idx=0
    weight_b = jax.random.normal(k3, (R, 1), dtype=jnp.float32)

    # --- inputs ---
    sequence = jax.random.randint(k4, (B, L), 0, user_num, dtype=jnp.int32)
    seq_neighbor = jax.random.randint(k5, (B, L, N), 0, user_num, dtype=jnp.int32)
    rel_neigh = jax.random.randint(k6, (B, L, N), 0, R + 1, dtype=jnp.int32)

    out = subgl_forward(sequence, seq_neighbor, rel_neigh, uem, rem, weight_b)
    out = jax.block_until_ready(out)

    # --- pure-JAX references ---
    beta = jax.nn.softmax(weight_b, axis=0)[:, 0]              # (R,)
    rel_w = rem[rel_neigh]                                     # (B, L, N, R)
    temp = jnp.einsum('blnr,r->bln', rel_w, beta)[..., None]   # (B, L, N, 1)

    def reference(emb_table):
        seq_e = emb_table[sequence]                            # (B, L, D)
        nei_e = emb_table[seq_neighbor]                        # (B, L, N, D)
        cas = seq_e + jnp.sum(temp * nei_e, axis=2)
        nrm = jnp.linalg.norm(cas, axis=2, keepdims=True)
        return cas / jnp.maximum(nrm, 1e-12)

    # (1) exact kernel math: same bf16 embedding transit, f32 accumulation.
    ref_bf16 = reference(uem.astype(jnp.bfloat16).astype(jnp.float32))
    assert np.allclose(np.asarray(out), np.asarray(ref_bf16), atol=1e-5, rtol=1e-5)

    # (2) pure-f32 module semantics: only the bf16 HBM-transit rounding differs.
    ref_f32 = reference(uem)
    assert np.allclose(np.asarray(out), np.asarray(ref_f32), atol=3e-2, rtol=3e-2)

    print("KERNEL_OK")
</pallas_src>

<mosaic_0001>
module attributes {stable_mosaic.version = 11 : i64} {
  func.func @subgl_kernel(%arg0: i32, %arg1: memref<128x32xbf16, #tpu.memory_space<vmem>>, %arg2: memref<128x128xbf16, #tpu.memory_space<vmem>>, %arg3: memref<128x4xf32, #tpu.memory_space<vmem>>, %arg4: memref<128x32xf32, #tpu.memory_space<vmem>>) attributes {dimension_semantics = [#tpu.dimension_semantics<parallel>], iteration_bounds = array<i64: 1>, scalar_prefetch = 0 : i64, scratch_operands = 0 : i64, tpu.core_type = #tpu.core_type<tc>, window_params = [{transform_indices = @transform_0, window_bounds = array<i64: 128, 32>}, {transform_indices = @transform_1, window_bounds = array<i64: 128, 128>}, {transform_indices = @transform_2, window_bounds = array<i64: 128, 4>}, {transform_indices = @transform_3, window_bounds = array<i64: 128, 32>}]} {
    %c0 = arith.constant 0 : index
    %c0_0 = arith.constant 0 : index
    %0 = vector.load %arg3[%c0, %c0_0] : memref<128x4xf32, #tpu.memory_space<vmem>>, vector<128x4xf32>
    %c0_1 = arith.constant 0 : index
    %c0_2 = arith.constant 0 : index
    %1 = vector.load %arg2[%c0_1, %c0_2] : memref<128x128xbf16, #tpu.memory_space<vmem>>, vector<128x128xbf16>
    %2 = arith.extf %1 : vector<128x128xbf16> to vector<128x128xf32>
    %c0_3 = arith.constant 0 : index
    %c0_4 = arith.constant 0 : index
    %3 = vector.load %arg1[%c0_3, %c0_4] : memref<128x32xbf16, #tpu.memory_space<vmem>>, vector<128x32xbf16>
    %4 = arith.extf %3 : vector<128x32xbf16> to vector<128x32xf32>
    %5 = vector.extract_strided_slice %0 {offsets = [0, 0], sizes = [128, 1], strides = [1, 1]} : vector<128x4xf32> to vector<128x1xf32>
    %6 = vector.extract_strided_slice %2 {offsets = [0, 0], sizes = [128, 32], strides = [1, 1]} : vector<128x128xf32> to vector<128x32xf32>
    %7 = vector.broadcast %5 : vector<128x1xf32> to vector<128x32xf32>
    %8 = arith.mulf %7, %6 : vector<128x32xf32>
    %9 = arith.addf %4, %8 : vector<128x32xf32>
    %10 = vector.extract_strided_slice %0 {offsets = [0, 1], sizes = [128, 1], strides = [1, 1]} : vector<128x4xf32> to vector<128x1xf32>
    %11 = vector.extract_strided_slice %2 {offsets = [0, 32], sizes = [128, 32], strides = [1, 1]} : vector<128x128xf32> to vector<128x32xf32>
    %12 = vector.broadcast %10 : vector<128x1xf32> to vector<128x32xf32>
    %13 = arith.mulf %12, %11 : vector<128x32xf32>
    %14 = arith.addf %9, %13 : vector<128x32xf32>
    %15 = vector.extract_strided_slice %0 {offsets = [0, 2], sizes = [128, 1], strides = [1, 1]} : vector<128x4xf32> to vector<128x1xf32>
    %16 = vector.extract_strided_slice %2 {offsets = [0, 64], sizes = [128, 32], strides = [1, 1]} : vector<128x128xf32> to vector<128x32xf32>
    %17 = vector.broadcast %15 : vector<128x1xf32> to vector<128x32xf32>
    %18 = arith.mulf %17, %16 : vector<128x32xf32>
    %19 = arith.addf %14, %18 : vector<128x32xf32>
    %20 = vector.extract_strided_slice %0 {offsets = [0, 3], sizes = [128, 1], strides = [1, 1]} : vector<128x4xf32> to vector<128x1xf32>
    %21 = vector.extract_strided_slice %2 {offsets = [0, 96], sizes = [128, 32], strides = [1, 1]} : vector<128x128xf32> to vector<128x32xf32>
    %22 = vector.broadcast %20 : vector<128x1xf32> to vector<128x32xf32>
    %23 = arith.mulf %22, %21 : vector<128x32xf32>
    %24 = arith.addf %19, %23 : vector<128x32xf32>
    %25 = arith.mulf %24, %24 : vector<128x32xf32>
    %cst = arith.constant dense<0.000000e+00> : vector<128xf32>
    %26 = vector.multi_reduction <add>, %25, %cst [1] : vector<128x32xf32> to vector<128xf32>
    %27 = vector.shape_cast %26 : vector<128xf32> to vector<128x1xf32>
    %cst_5 = arith.constant 1.000000e-24 : f32
    %28 = vector.broadcast %cst_5 : f32 to vector<128x1xf32>
    %29 = arith.maximumf %27, %28 : vector<128x1xf32>
    %30 = math.rsqrt %29 : vector<128x1xf32>
    %31 = vector.broadcast %30 : vector<128x1xf32> to vector<128x32xf32>
    %32 = arith.mulf %24, %31 : vector<128x32xf32>
    %c0_6 = arith.constant 0 : index
    %c0_7 = arith.constant 0 : index
    %33 = vector.load %arg4[%c0_6, %c0_7] : memref<128x32xf32, #tpu.memory_space<vmem>>, vector<128x32xf32>
    tpu.vector_store %arg4[%c0_6, %c0_7], %32 {strides = array<i32>} : memref<128x32xf32, #tpu.memory_space<vmem>>, vector<128x32xf32>,
    return
  }
  func.func @transform_0(%arg0: i32) -> (i32, i32) {
    %c0_i32 = arith.constant 0 : i32
    %c0_i32_0 = arith.constant 0 : i32
    return %arg0, %c0_i32 : i32, i32
  }
  func.func @transform_1(%arg0: i32) -> (i32, i32) {
    %c0_i32 = arith.constant 0 : i32
    %c0_i32_0 = arith.constant 0 : i32
    return %arg0, %c0_i32 : i32, i32
  }
  func.func @transform_2(%arg0: i32) -> (i32, i32) {
    %c0_i32 = arith.constant 0 : i32
    %c0_i32_0 = arith.constant 0 : i32
    return %arg0, %c0_i32 : i32, i32
  }
  func.func @transform_3(%arg0: i32) -> (i32, i32) {
    %c0_i32 = arith.constant 0 : i32
    %c0_i32_0 = arith.constant 0 : i32
    return %arg0, %c0_i32 : i32, i32
  }
}

</mosaic_0001>

<bundles_post_ra>
// kernel: tpu_custom_call.1
= control target key start
LH: loop header
LB: loop body
LE: loop exit
PB: predicated region body
PF: predicated region fallthrough
CT: control target
= control target key end

     0   :  { %v944_v0 = vmov 0   ;;  %v945_v17 = vmov 1   ;;  %v946_v18 = vmov 2   ;;  %v947_v19 = vmov 3   ;;  %s948_s20 = smov 96   ;;  %s950_s6 = smov 32   ;;  %s1599_s2 = inlined_call_operand.vmem [shape: f32[128,4], index: 2, kind: input, shape index: {}]   ;;  %s1600_s1 = inlined_call_operand.vmem [shape: bf16[128,128], index: 1, kind: input, shape index: {}]   ;;  %s1601_s0 = inlined_call_operand.vmem [shape: bf16[128,32], index: 0, kind: input, shape index: {}]   ;;  %s1602_s3 = inlined_call_operand.vmem [shape: f32[128,32], index: 3, kind: output, shape index: {}]  }
   0x1   :  { %905 = vset.pattern.permute.xlu1 %v944_v0  ;;  %904 = vset.pattern.permute.xlu0 %v944_v0  ;;  %v974_v1 = vld [vmem:[%s1599_s2 + $0x10] sm:$0xff]  ;;  %v979_v2 = vld [vmem:[%s1599_s2] sm:$0xff]  ;;  %v986_v3 = vld [vmem:[%s1599_s2 + $0x18] sm:$0xff]  ;;  %vm702_vm0 = vcmask 261120  }
   0x2   :  { %106 = vperm.xlu1 %905, %v974_v1   ;;  %96 = vperm.xlu0 %904, %v979_v2   ;;  %v991_v4 = vld [vmem:[%s1599_s2 + $0x8] sm:$0xff]  ;;  %v1003_v6 = vld [vmem:[%s1599_s2 + $0x20] sm:$0xff]  ;;  %v1010_v7 = vld [vmem:[%s1599_s2 + $0x38] sm:$0xff] }
   0x3   :  { %v998_v5 = vld [vmem:[%s1599_s2 + $0x28] sm:$0xff]  ;;  %v1015_v8 = vld [vmem:[%s1599_s2 + $0x30] sm:$0xff]  ;;  %v1027_v10 = vld [vmem:[%s1599_s2 + $0x40] sm:$0xff] }
   0x4   :  { %v1022_v9 = vld [vmem:[%s1599_s2 + $0x48] sm:$0xff]  ;;  %v1034_v11 = vld [vmem:[%s1599_s2 + $0x58] sm:$0xff]  ;;  %v1039_v12 = vld [vmem:[%s1599_s2 + $0x50] sm:$0xff] }
   0x5   :  { %v1046_v13 = vld [vmem:[%s1599_s2 + $0x68] sm:$0xff]  ;;  %v1051_v14 = vld [vmem:[%s1599_s2 + $0x60] sm:$0xff]  ;;  %v1058_v15 = vld [vmem:[%s1599_s2 + $0x78] sm:$0xff] }
   0x6   :  { %111 = vperm.xlu1 %905, %v986_v3   ;;  %101 = vperm.xlu0 %904, %v991_v4   ;;  %v1063_v16 = vld [vmem:[%s1599_s2 + $0x70] sm:$0xff]  ;;  %v820_v36 = vld [vmem:[%s1600_s1] sm:$0xff]   ;;  %v883_v39 = vld [vmem:[%s1600_s1 + $0x8] sm:$0xff]  }
   0x7   :  { %v1134_v37 = vunpack.c.l.bf16 %v820_v36  ;;  %v1136_v38 = vunpack.c.h.bf16 %v820_v36  ;;  %v1143_v44 = vunpack.c.l.bf16 %v883_v39  ;;  %v1145_v45 = vunpack.c.h.bf16 %v883_v39  ;;  %v884_v46 = vld [vmem:[%s1600_s1 + $0x10] sm:$0xff]   ;;  %v885_v53 = vld [vmem:[%s1600_s1 + $0x18] sm:$0xff]   ;;  %v886_v60 = vld [vmem:[%s1600_s1 + $0x20] sm:$0xff]  }
   0x8   :  { %v1154_v51 = vunpack.c.h.bf16 %v884_v46  ;;  %v1156_v52 = vunpack.c.l.bf16 %v884_v46  ;;  %v1165_v58 = vunpack.c.h.bf16 %v885_v53  ;;  %v1167_v59 = vunpack.c.l.bf16 %v885_v53  ;;  %v888_v46 = vld [vmem:[%s1600_s1 + $0x30] sm:$0xff]  }
   0x9   :  { %v1198_v53 = vunpack.c.h.bf16 %v888_v46 }
   0xa   :  { %121 = vperm.xlu1 %905, %v998_v5   ;;  %116 = vperm.xlu0 %904, %v1003_v6  }
   0xe   :  { %131 = vperm.xlu1 %905, %v1010_v7   ;;  %126 = vperm.xlu0 %904, %v1015_v8  }
  0x12   :  { %141 = vperm.xlu1 %905, %v1022_v9   ;;  %136 = vperm.xlu0 %904, %v1027_v10  }
  0x16   :  { %151 = vperm.xlu1 %905, %v1034_v11   ;;  %146 = vperm.xlu0 %904, %v1039_v12  }
  0x1a   :  { %161 = vperm.xlu1 %905, %v1046_v13   ;;  %156 = vperm.xlu0 %904, %v1051_v14  }
  0x1e   :  { %171 = vperm.xlu1 %905, %v1058_v15   ;;  %166 = vperm.xlu0 %904, %v1063_v16  }
  0x22   :  { %907 = vset.pattern.permute.xlu1 %v945_v17  ;;  %906 = vset.pattern.permute.xlu0 %v945_v17  ;;  %v1176_v17 = vunpack.c.h.bf16 %v886_v60 }
  0x23   :  { %211 = vperm.xlu1 %907, %v991_v4   ;;  %207 = vperm.xlu0 %906, %v979_v2  }
  0x27   :  { %215 = vperm.xlu1 %907, %v974_v1   ;;  %219 = vperm.xlu0 %906, %v986_v3  }
  0x2b   :  { %223 = vperm.xlu1 %907, %v1003_v6   ;;  %227 = vperm.xlu0 %906, %v998_v5  }
  0x2f   :  { %231 = vperm.xlu1 %907, %v1015_v8   ;;  %235 = vperm.xlu0 %906, %v1010_v7  }
  0x33   :  { %239 = vperm.xlu1 %907, %v1027_v10   ;;  %243 = vperm.xlu0 %906, %v1022_v9  }
  0x37   :  { %247 = vperm.xlu1 %907, %v1039_v12   ;;  %251 = vperm.xlu0 %906, %v1034_v11  }
  0x3b   :  { %255 = vperm.xlu1 %907, %v1051_v14   ;;  %259 = vperm.xlu0 %906, %v1046_v13  }
  0x3f   :  { %263 = vperm.xlu1 %907, %v1063_v16   ;;  %267 = vperm.xlu0 %906, %v1058_v15  }
  0x43   :  { %908 = vset.pattern.permute.xlu1 %v946_v18  ;;  %909 = vset.pattern.permute.xlu0 %v946_v18  ;;  %v1178_v18 = vunpack.c.l.bf16 %v886_v60 }
  0x44   :  { %367 = vperm.xlu1 %908, %v979_v2   ;;  %371 = vperm.xlu0 %909, %v991_v4  }
  0x48   :  { %375 = vperm.xlu1 %908, %v974_v1   ;;  %383 = vperm.xlu0 %909, %v1003_v6  }
  0x4c   :  { %379 = vperm.xlu1 %908, %v986_v3   ;;  %391 = vperm.xlu0 %909, %v1015_v8  }
  0x50   :  { %387 = vperm.xlu1 %908, %v998_v5   ;;  %399 = vperm.xlu0 %909, %v1027_v10  }
  0x54   :  { %395 = vperm.xlu1 %908, %v1010_v7   ;;  %407 = vperm.xlu0 %909, %v1039_v12  }
  0x58   :  { %403 = vperm.xlu1 %908, %v1022_v9   ;;  %415 = vperm.xlu0 %909, %v1051_v14  }
  0x5c   :  { %411 = vperm.xlu1 %908, %v1034_v11   ;;  %423 = vperm.xlu0 %909, %v1063_v16  }
  0x60   :  { %419 = vperm.xlu1 %908, %v1046_v13   ;;  %910 = vset.pattern.permute.xlu0 %v947_v19 }
  0x64   :  { %427 = vperm.xlu1 %908, %v1058_v15  }
  0x68   :  { %911 = vset.pattern.permute.xlu1 %v947_v19  ;;  %v887_v19 = vld [vmem:[%s1600_s1 + $0x28] sm:$0xff]  }
  0x81   :  { %v1099_v20 = vpop.permute.xlu1 %106  ;;  %v1101_v21 = vpop.permute.xlu0 %96 }
  0x85   :  { %v1103_v22 = vpop.permute.xlu1 %111  ;;  %v1105_v23 = vpop.permute.xlu0 %101 }
  0x89   :  { %v1107_v24 = vpop.permute.xlu1 %121  ;;  %v1109_v25 = vpop.permute.xlu0 %116 }
  0x8d   :  { %v1111_v26 = vpop.permute.xlu1 %131  ;;  %v1113_v27 = vpop.permute.xlu0 %126 }
  0x91   :  { %v1115_v28 = vpop.permute.xlu1 %141  ;;  %v1117_v29 = vpop.permute.xlu0 %136 }
  0x95   :  { %v1119_v30 = vpop.permute.xlu1 %151  ;;  %v1121_v31 = vpop.permute.xlu0 %146 }
  0x99   :  { %v1123_v32 = vpop.permute.xlu1 %161  ;;  %v1125_v33 = vpop.permute.xlu0 %156 }
  0x9d   :  { %v1127_v34 = vpop.permute.xlu1 %171  ;;  %v1129_v35 = vpop.permute.xlu0 %166 }
  0x9e   :  { %1605 = vst [vmem:[#allocation2_spill] sm:$0xff] %v1129_v35 }
  0xa2   :  { %v212_v40 = vpop.permute.xlu1 %211  ;;  %v208_v41 = vpop.permute.xlu0 %207 }
  0xa3   :  { %v271_v42 = vmul.f32 %v1136_v38, %v212_v40  ;;  %v270_v43 = vmul.f32 %v1134_v37, %v208_v41 }
  0xa5   :  { %304 = vrot.lane.b32.xlu0 %v271_v42, %s948_s20  ;;  %302 = vrot.lane.b32.xlu1 %v270_v43, %s948_s20  ;;  %v1187_v42 = vunpack.c.h.bf16 %v887_v19  ;;  %v1189_v43 = vunpack.c.l.bf16 %v887_v19 }
  0xa6   :  { %v216_v47 = vpop.permute.xlu1 %215  ;;  %v220_v48 = vpop.permute.xlu0 %219 }
  0xa7   :  { %v272_v49 = vmul.f32 %v1143_v44, %v216_v47  ;;  %v273_v50 = vmul.f32 %v1145_v45, %v220_v48 }
  0xa9   :  { %308 = vrot.lane.b32.xlu0 %v273_v50, %s948_s20  ;;  %306 = vrot.lane.b32.xlu1 %v272_v49, %s948_s20 }
  0xaa   :  { %v224_v54 = vpop.permute.xlu1 %223  ;;  %v228_v55 = vpop.permute.xlu0 %227 }
  0xab   :  { %v274_v56 = vmul.f32 %v1156_v52, %v224_v54  ;;  %v275_v57 = vmul.f32 %v1154_v51, %v228_v55  ;;  %v1200_v54 = vunpack.c.l.bf16 %v888_v46  ;;  %v889_v55 = vld [vmem:[%s1600_s1 + $0x38] sm:$0xff]   ;;  %s949_s1 = smov 64  }
  0xad   :  { %312 = vrot.lane.b32.xlu0 %v275_v57, %s948_s20  ;;  %310 = vrot.lane.b32.xlu1 %v274_v56, %s948_s20 }
  0xae   :  { %v232_v61 = vpop.permute.xlu1 %231  ;;  %v236_v62 = vpop.permute.xlu0 %235 }
  0xaf   :  { %v276_v63 = vmul.f32 %v1167_v59, %v232_v61  ;;  %v277_v0 = vmul.f32 %v1165_v58, %v236_v62  ;;  %v1209_v62 = vunpack.c.h.bf16 %v889_v55 }
  0xb1   :  { %316 = vrot.lane.b32.xlu0 %v277_v0, %s948_s20  ;;  %314 = vrot.lane.b32.xlu1 %v276_v63, %s948_s20  ;;  %1606 = vst [vmem:[#allocation3_spill] sm:$0xff] %v1209_v62  ;;  %v1211_v63 = vunpack.c.l.bf16 %v889_v55 }
  0xb2   :  { %v240_v36 = vpop.permute.xlu1 %239  ;;  %v244_v39 = vpop.permute.xlu0 %243 }
  0xb3   :  { %v278_v40 = vmul.f32 %v1178_v18, %v240_v36  ;;  %v279_v41 = vmul.f32 %v1176_v17, %v244_v39  ;;  %1607 = vst [vmem:[#allocation4_spill] sm:$0xff] %v1211_v63 }
  0xb5   :  { %320 = vrot.lane.b32.xlu0 %v279_v41, %s948_s20  ;;  %318 = vrot.lane.b32.xlu1 %v278_v40, %s948_s20 }
  0xb6   :  { %v248_v47 = vpop.permute.xlu1 %247  ;;  %v252_v48 = vpop.permute.xlu0 %251 }
  0xb7   :  { %v280_v49 = vmul.f32 %v1189_v43, %v248_v47  ;;  %v281_v50 = vmul.f32 %v1187_v42, %v252_v48 }
  0xb9   :  { %324 = vrot.lane.b32.xlu0 %v281_v50, %s948_s20  ;;  %322 = vrot.lane.b32.xlu1 %v280_v49, %s948_s20 }
  0xba   :  { %v256_v56 = vpop.permute.xlu1 %255  ;;  %v260_v57 = vpop.permute.xlu0 %259 }
  0xbb   :  { %v282_v60 = vmul.f32 %v1200_v54, %v256_v56  ;;  %v283_v61 = vmul.f32 %v1198_v53, %v260_v57 }
  0xbd   :  { %328 = vrot.lane.b32.xlu0 %v283_v61, %s948_s20  ;;  %326 = vrot.lane.b32.xlu1 %v282_v60, %s948_s20 }
  0xbe   :  { %v264_v0 = vpop.permute.xlu1 %263  ;;  %v268_v19 = vpop.permute.xlu0 %267 }
  0xbf   :  { %v284_v36 = vmul.f32 %v1211_v63, %v264_v0  ;;  %v285_v39 = vmul.f32 %v1209_v62, %v268_v19 }
  0xc1   :  { %332 = vrot.lane.b32.xlu0 %v285_v39, %s948_s20  ;;  %330 = vrot.lane.b32.xlu1 %v284_v36, %s948_s20 }
  0xc3   :  { %v368_v40 = vpop.permute.xlu1 %367 }
  0xc5   :  { %527 = vperm.xlu0 %910, %v979_v2   ;;  %531 = vperm.xlu1 %911, %v991_v4   ;;  %v372_v4 = vpop.permute.xlu0 %371 }
  0xc7   :  { %v376_v41 = vpop.permute.xlu1 %375 }
  0xc9   :  { %539 = vperm.xlu0 %910, %v986_v3   ;;  %535 = vperm.xlu1 %911, %v974_v1   ;;  %v384_v3 = vpop.permute.xlu0 %383 }
  0xcb   :  { %v380_v2 = vpop.permute.xlu1 %379 }
  0xcd   :  { %547 = vperm.xlu0 %910, %v998_v5   ;;  %543 = vperm.xlu1 %911, %v1003_v6   ;;  %v430_v5 = vmul.f32 %v1134_v37, %v368_v40  ;;  %v431_v6 = vmul.f32 %v1136_v38, %v372_v4 }
  0xcf   :  { %v388_v1 = vpop.permute.xlu1 %387 }
  0xd1   :  { %555 = vperm.xlu0 %910, %v1010_v7   ;;  %551 = vperm.xlu1 %911, %v1015_v8   ;;  %v392_v8 = vpop.permute.xlu0 %391 }
  0xd3   :  { %v396_v7 = vpop.permute.xlu1 %395 }
  0xd5   :  { %563 = vperm.xlu0 %910, %v1022_v9   ;;  %559 = vperm.xlu1 %911, %v1027_v10   ;;  %v432_v9 = vmul.f32 %v1143_v44, %v376_v41  ;;  %v433_v10 = vmul.f32 %v1145_v45, %v380_v2 }
  0xd9   :  { %571 = vperm.xlu0 %910, %v1034_v11   ;;  %567 = vperm.xlu1 %911, %v1039_v12   ;;  %v404_v11 = vpop.permute.xlu1 %403  ;;  %v400_v12 = vpop.permute.xlu0 %399 }
  0xda   :  { %v439_v48 = vmul.f32 %v1176_v17, %v404_v11  ;;  %v438_v49 = vmul.f32 %v1178_v18, %v400_v12 }
  0xdd   :  { %579 = vperm.xlu0 %910, %v1046_v13   ;;  %575 = vperm.xlu1 %911, %v1051_v14   ;;  %v435_v13 = vmul.f32 %v1154_v51, %v388_v1  ;;  %v434_v14 = vmul.f32 %v1156_v52, %v384_v3  ;;  %v412_v46 = vpop.permute.xlu1 %411  ;;  %v408_v47 = vpop.permute.xlu0 %407 }
  0xde   :  { %v441_v56 = vmul.f32 %v1187_v42, %v412_v46  ;;  %v440_v57 = vmul.f32 %v1189_v43, %v408_v47 }
  0xe1   :  { %587 = vperm.xlu0 %910, %v1058_v15   ;;  %583 = vperm.xlu1 %911, %v1063_v16   ;;  %v437_v15 = vmul.f32 %v1165_v58, %v396_v7  ;;  %v436_v16 = vmul.f32 %v1167_v59, %v392_v8  ;;  %v420_v50 = vpop.permute.xlu1 %419  ;;  %v416_v55 = vpop.permute.xlu0 %415 }
  0xe2   :  { %v443_v60 = vmul.f32 %v1198_v53, %v420_v50  ;;  %v442_v61 = vmul.f32 %v1200_v54, %v416_v55 }
  0xe5   :  { %464 = vrot.lane.b32.xlu0 %v431_v6, %s949_s1  ;;  %462 = vrot.lane.b32.xlu1 %v430_v5, %s949_s1  ;;  %v428_v0 = vpop.permute.xlu1 %427  ;;  %v424_v19 = vpop.permute.xlu0 %423 }
  0xe6   :  { %v445_v36 = vmul.f32 %v1209_v62, %v428_v0  ;;  %v444_v39 = vmul.f32 %v1211_v63, %v424_v19 }
  0xe9   :  { %468 = vrot.lane.b32.xlu0 %v433_v10, %s949_s1  ;;  %466 = vrot.lane.b32.xlu1 %v432_v9, %s949_s1 }
  0xed   :  { %472 = vrot.lane.b32.xlu0 %v435_v13, %s949_s1  ;;  %470 = vrot.lane.b32.xlu1 %v434_v14, %s949_s1 }
  0xf1   :  { %476 = vrot.lane.b32.xlu0 %v437_v15, %s949_s1  ;;  %474 = vrot.lane.b32.xlu1 %v436_v16, %s949_s1 }
  0xf5   :  { %480 = vrot.lane.b32.xlu0 %v439_v48, %s949_s1  ;;  %478 = vrot.lane.b32.xlu1 %v438_v49, %s949_s1 }
  0xf9   :  { %484 = vrot.lane.b32.xlu0 %v441_v56, %s949_s1  ;;  %482 = vrot.lane.b32.xlu1 %v440_v57, %s949_s1 }
  0xfd   :  { %488 = vrot.lane.b32.xlu0 %v443_v60, %s949_s1  ;;  %486 = vrot.lane.b32.xlu1 %v442_v61, %s949_s1 }
 0x101   :  { %492 = vrot.lane.b32.xlu0 %v445_v36, %s949_s1  ;;  %490 = vrot.lane.b32.xlu1 %v444_v39, %s949_s1 }
 0x117   :  { %v1267_v40 = vpop.permute.xlu0 %304  ;;  %v1269_v41 = vpop.permute.xlu1 %302 }
 0x11b   :  { %v1271_v2 = vpop.permute.xlu0 %308  ;;  %v1273_v4 = vpop.permute.xlu1 %306 }
 0x11f   :  { %v1275_v1 = vpop.permute.xlu0 %312  ;;  %v1277_v3 = vpop.permute.xlu1 %310 }
 0x123   :  { %v1279_v5 = vpop.permute.xlu0 %316  ;;  %v1281_v6 = vpop.permute.xlu1 %314 }
 0x127   :  { %v1283_v7 = vpop.permute.xlu0 %320  ;;  %v1285_v8 = vpop.permute.xlu1 %318 }
 0x12b   :  { %v1287_v9 = vpop.permute.xlu0 %324  ;;  %v1289_v10 = vpop.permute.xlu1 %322 }
 0x12f   :  { %v1291_v11 = vpop.permute.xlu0 %328  ;;  %v1293_v12 = vpop.permute.xlu1 %326 }
 0x130   :  { %1608 = vst [vmem:[#allocation5_spill] sm:$0xff] %v1291_v11  ;;  %1609 = vst [vmem:[#allocation6_spill] sm:$0xff] %v1293_v12  ;;  %v890_v11 = vld [vmem:[%s1601_s0 + $0x8] sm:$0xff]  }
 0x133   :  { %v1295_v13 = vpop.permute.xlu0 %332  ;;  %v1297_v14 = vpop.permute.xlu1 %330 }
 0x134   :  { %1610 = vst [vmem:[#allocation7_spill] sm:$0xff] %v1295_v13  ;;  %1611 = vst [vmem:[#allocation8_spill] sm:$0xff] %v1297_v14  ;;  %v175_v14 = vmul.f32 %v1136_v38, %v1105_v23 }
 0x144   :  { %v528_v15 = vpop.permute.xlu0 %527  ;;  %v532_v16 = vpop.permute.xlu1 %531 }
 0x145   :  { %v590_v46 = vmul.f32 %v1134_v37, %v528_v15  ;;  %v591_v47 = vmul.f32 %v1136_v38, %v532_v16  ;;  %v179_v38 = vmul.f32 %v1154_v51, %v1107_v24 }
 0x147   :  { %622 = vrot.lane.b32.xlu1 %v590_v46, %s950_s6  ;;  %624 = vrot.lane.b32.xlu0 %v591_v47, %s950_s6 }
 0x148   :  { %v540_v48 = vpop.permute.xlu0 %539  ;;  %v536_v49 = vpop.permute.xlu1 %535 }
 0x149   :  { %v593_v50 = vmul.f32 %v1145_v45, %v540_v48  ;;  %v592_v55 = vmul.f32 %v1143_v44, %v536_v49 }
 0x14b   :  { %628 = vrot.lane.b32.xlu0 %v593_v50, %s950_s6  ;;  %626 = vrot.lane.b32.xlu1 %v592_v55, %s950_s6 }
 0x14c   :  { %v548_v56 = vpop.permute.xlu0 %547  ;;  %v544_v57 = vpop.permute.xlu1 %543 }
 0x14d   :  { %v595_v60 = vmul.f32 %v1154_v51, %v548_v56  ;;  %v594_v61 = vmul.f32 %v1156_v52, %v544_v57 }
 0x14f   :  { %632 = vrot.lane.b32.xlu0 %v595_v60, %s950_s6  ;;  %630 = vrot.lane.b32.xlu1 %v594_v61, %s950_s6 }
 0x150   :  { %v556_v0 = vpop.permute.xlu0 %555  ;;  %v552_v19 = vpop.permute.xlu1 %551 }
 0x151   :  { %v597_v36 = vmul.f32 %v1165_v58, %v556_v0  ;;  %v596_v39 = vmul.f32 %v1167_v59, %v552_v19 }
 0x153   :  { %636 = vrot.lane.b32.xlu0 %v597_v36, %s950_s6  ;;  %634 = vrot.lane.b32.xlu1 %v596_v39, %s950_s6 }
 0x154   :  { %v564_v15 = vpop.permute.xlu0 %563  ;;  %v560_v16 = vpop.permute.xlu1 %559 }
 0x155   :  { %v599_v46 = vmul.f32 %v1176_v17, %v564_v15  ;;  %v598_v47 = vmul.f32 %v1178_v18, %v560_v16 }
 0x157   :  { %640 = vrot.lane.b32.xlu0 %v599_v46, %s950_s6  ;;  %638 = vrot.lane.b32.xlu1 %v598_v47, %s950_s6 }
 0x158   :  { %v572_v48 = vpop.permute.xlu0 %571  ;;  %v568_v49 = vpop.permute.xlu1 %567 }
 0x159   :  { %v601_v50 = vmul.f32 %v1187_v42, %v572_v48  ;;  %v600_v55 = vmul.f32 %v1189_v43, %v568_v49 }
 0x15b   :  { %644 = vrot.lane.b32.xlu0 %v601_v50, %s950_s6  ;;  %642 = vrot.lane.b32.xlu1 %v600_v55, %s950_s6 }
 0x15c   :  { %v580_v56 = vpop.permute.xlu0 %579  ;;  %v576_v57 = vpop.permute.xlu1 %575 }
 0x15d   :  { %v603_v60 = vmul.f32 %v1198_v53, %v580_v56  ;;  %v602_v61 = vmul.f32 %v1200_v54, %v576_v57 }
 0x15f   :  { %648 = vrot.lane.b32.xlu0 %v603_v60, %s950_s6  ;;  %646 = vrot.lane.b32.xlu1 %v602_v61, %s950_s6 }
 0x160   :  { %v588_v0 = vpop.permute.xlu0 %587  ;;  %v584_v19 = vpop.permute.xlu1 %583 }
 0x161   :  { %v605_v36 = vmul.f32 %v1209_v62, %v588_v0  ;;  %v604_v39 = vmul.f32 %v1211_v63, %v584_v19  ;;  %v852_v0 = vld [vmem:[%s1601_s0] sm:$0xff]  }
 0x162   :  { %v854_v13 = vunpack.c.h.bf16 %v852_v0  ;;  %v853_v12 = vunpack.c.l.bf16 %v852_v0 }
 0x163   :  { %652 = vrot.lane.b32.xlu0 %v605_v36, %s950_s6  ;;  %650 = vrot.lane.b32.xlu1 %v604_v39, %s950_s6  ;;  %v174_v39 = vmul.f32 %v1134_v37, %v1101_v21  ;;  %v177_v21 = vmul.f32 %v1145_v45, %v1103_v22  ;;  %v178_v22 = vmul.f32 %v1156_v52, %v1109_v25 }
 0x164   :  { %v465_v15 = vpop.permute.xlu0 %464  ;;  %v463_v16 = vpop.permute.xlu1 %462  ;;  %v191_v37 = vadd.f32 %v854_v13, %v175_v14  ;;  %v181_v52 = vmul.f32 %v1165_v58, %v1111_v26 }
 0x165   :  { %v190_v23 = vadd.f32 %v853_v12, %v174_v39 }
 0x166   :  { %v351_v62 = vadd.f32 %v1267_v40, %v191_v37  ;;  %v893_v37 = vld [vmem:[%s1601_s0 + $0x20] sm:$0xff]  }
 0x167   :  { %v870_v58 = vunpack.c.h.bf16 %v893_v37 }
 0x168   :  { %v469_v46 = vpop.permute.xlu0 %468  ;;  %v467_v47 = vpop.permute.xlu1 %466  ;;  %v511_v24 = vadd.f32 %v465_v15, %v351_v62  ;;  %v180_v62 = vmul.f32 %v1167_v59, %v1113_v27  ;;  %v894_v59 = vld [vmem:[%s1601_s0 + $0x28] sm:$0xff]  }
 0x16c   :  { %v1331_v48 = vpop.permute.xlu0 %472  ;;  %v1333_v49 = vpop.permute.xlu1 %470 }
 0x170   :  { %v1335_v50 = vpop.permute.xlu0 %476  ;;  %v1337_v55 = vpop.permute.xlu1 %474 }
 0x174   :  { %v1339_v56 = vpop.permute.xlu0 %480  ;;  %v1341_v57 = vpop.permute.xlu1 %478 }
 0x178   :  { %v1343_v60 = vpop.permute.xlu0 %484  ;;  %v1345_v61 = vpop.permute.xlu1 %482 }
 0x179   :  { %1612 = vst [vmem:[#allocation9_spill] sm:$0xff] %v1343_v60  ;;  %1613 = vst [vmem:[#allocation10_spill] sm:$0xff] %v1345_v61  ;;  %v891_v61 = vld [vmem:[%s1601_s0 + $0x10] sm:$0xff]   ;;  %v858_v60 = vunpack.c.h.bf16 %v890_v11 }
 0x17a   :  { %v862_v0 = vunpack.c.h.bf16 %v891_v61 }
 0x17b   :  { %v193_v45 = vadd.f32 %v858_v60, %v177_v21 }
 0x17c   :  { %v1350_v19 = vpop.permute.xlu0 %488  ;;  %v1352_v36 = vpop.permute.xlu1 %486  ;;  %v195_v13 = vadd.f32 %v862_v0, %v179_v38 }
 0x17d   :  { %1614 = vst [vmem:[#allocation11_spill] sm:$0xff] %v1350_v19  ;;  %1615 = vst [vmem:[#allocation12_spill] sm:$0xff] %v1352_v36  ;;  %v857_v19 = vunpack.c.l.bf16 %v890_v11  ;;  %v176_v36 = vmul.f32 %v1143_v44, %v1099_v20  ;;  %v350_v11 = vadd.f32 %v1269_v41, %v190_v23  ;;  %v892_v20 = vld [vmem:[%s1601_s0 + $0x18] sm:$0xff]   ;;  %v861_v44 = vunpack.c.l.bf16 %v891_v61 }
 0x17e   :  { %v866_v14 = vunpack.c.h.bf16 %v892_v20  ;;  %v865_v39 = vunpack.c.l.bf16 %v892_v20  ;;  %v353_v40 = vadd.f32 %v1271_v2, %v193_v45 }
 0x17f   :  { %v192_v12 = vadd.f32 %v857_v19, %v176_v36  ;;  %v510_v51 = vadd.f32 %v463_v16, %v350_v11  ;;  %v194_v15 = vadd.f32 %v861_v44, %v178_v22 }
 0x180   :  { %v1370_v63 = vpop.permute.xlu0 %492  ;;  %v1372_v35 = vpop.permute.xlu1 %490  ;;  %v513_v16 = vadd.f32 %v469_v46, %v353_v40 }
 0x181   :  { %1616 = vst [vmem:[#allocation13_spill] sm:$0xff] %v1370_v63  ;;  %1617 = vst [vmem:[#allocation14_spill] sm:$0xff] %v1372_v35  ;;  %v352_v41 = vadd.f32 %v1273_v4, %v192_v12  ;;  %v354_v26 = vadd.f32 %v1277_v3, %v194_v15  ;;  %v869_v3 = vunpack.c.l.bf16 %v893_v37 }
 0x183   :  { %v512_v2 = vadd.f32 %v467_v47, %v352_v41  ;;  %v514_v38 = vadd.f32 %v1333_v49, %v354_v26 }
 0x1b9   :  { %v625_v35 = vpop.permute.xlu0 %624  ;;  %v623_v63 = vpop.permute.xlu1 %622 }
 0x1ba   :  { %v1386_v23 = vadd.f32 %v625_v35, %v511_v24  ;;  %v1388_v25 = vadd.f32 %v623_v63, %v510_v51  ;;  %v183_v35 = vmul.f32 %v1176_v17, %v1115_v28  ;;  %v355_v63 = vadd.f32 %v1275_v1, %v195_v13 }
 0x1bb   :  { %v182_v28 = vmul.f32 %v1178_v18, %v1117_v29  ;;  %v197_v17 = vadd.f32 %v866_v14, %v181_v52  ;;  %v196_v1 = vadd.f32 %v865_v39, %v180_v62  ;;  %v874_v18 = vunpack.c.h.bf16 %v894_v59 }
 0x1bc   :  { %v687_v4 = vmul.f32 %v1386_v23, %v1386_v23  ;;  %v686_v60 = vmul.f32 %v1388_v25, %v1388_v25  ;;  %v515_v21 = vadd.f32 %v1331_v48, %v355_v63  ;;  %v199_v29 = vadd.f32 %v870_v58, %v183_v35  ;;  %v895_v48 = vld [vmem:[%s1601_s0 + $0x30] sm:$0xff]  }
 0x1bd   :  { %v629_v61 = vpop.permute.xlu0 %628  ;;  %v627_v27 = vpop.permute.xlu1 %626  ;;  %v357_v20 = vadd.f32 %v1279_v5, %v197_v17  ;;  %v356_v22 = vadd.f32 %v1281_v6, %v196_v1  ;;  %v185_v5 = vmul.f32 %v1187_v42, %v1119_v30  ;;  %v184_v6 = vmul.f32 %v1189_v43, %v1121_v31  ;;  %v1619_v17 = vld [vmem:[#allocation2_spill] sm:$0xff]  ;;  %v1620_v1 = vld [vmem:[#allocation4_spill] sm:$0xff] }
 0x1be   :  { %v1405_v46 = vadd.f32 %v629_v61, %v513_v16  ;;  %v1407_v47 = vadd.f32 %v627_v27, %v512_v2  ;;  %v706_v19 = vsel %vm702_vm0, %v687_v4, 0.0  ;;  %v703_v36 = vsel %vm702_vm0, %v686_v60, 0.0 }
 0x1bf   :  { %707 = vadd.xlane.f32.xlu0 %v706_v19  ;;  %704 = vadd.xlane.f32.xlu1 %v703_v36  ;;  %v198_v13 = vadd.f32 %v869_v3, %v182_v28  ;;  %v873_v14 = vunpack.c.l.bf16 %v894_v59  ;;  %v517_v39 = vadd.f32 %v1335_v50, %v357_v20  ;;  %v516_v40 = vadd.f32 %v1337_v55, %v356_v22  ;;  %v896_v50 = vld [vmem:[%s1601_s0 + $0x38] sm:$0xff]   ;;  %v1618_v36 = vld [vmem:[#allocation3_spill] sm:$0xff] }
 0x1c0   :  { %v689_v0 = vmul.f32 %v1405_v46, %v1405_v46  ;;  %v688_v11 = vmul.f32 %v1407_v47, %v1407_v47  ;;  %v187_v30 = vmul.f32 %v1198_v53, %v1123_v32  ;;  %v359_v42 = vadd.f32 %v1283_v7, %v199_v29  ;;  %v1623_v29 = vld [vmem:[#allocation5_spill] sm:$0xff] }
 0x1c1   :  { %v633_v44 = vpop.permute.xlu0 %632  ;;  %v631_v45 = vpop.permute.xlu1 %630  ;;  %v358_v31 = vadd.f32 %v1285_v8, %v198_v13  ;;  %v878_v43 = vunpack.c.h.bf16 %v895_v48  ;;  %v186_v32 = vmul.f32 %v1200_v54, %v1125_v33  ;;  %v201_v53 = vadd.f32 %v874_v18, %v185_v5 }
 0x1c2   :  { %v1424_v12 = vadd.f32 %v633_v44, %v515_v21  ;;  %v1426_v49 = vadd.f32 %v631_v45, %v514_v38  ;;  %v709_v24 = vsel %vm702_vm0, %v688_v11, 0.0  ;;  %v712_v51 = vsel %vm702_vm0, %v689_v0, 0.0  ;;  %v1621_v21 = vld [vmem:[#allocation9_spill] sm:$0xff]  ;;  %v1622_v0 = vld [vmem:[#allocation10_spill] sm:$0xff] }
 0x1c3   :  { %710 = vadd.xlane.f32.xlu0 %v709_v24  ;;  %713 = vadd.xlane.f32.xlu1 %v712_v51  ;;  %v200_v7 = vadd.f32 %v873_v14, %v184_v6  ;;  %v877_v8 = vunpack.c.l.bf16 %v895_v48  ;;  %v519_v4 = vadd.f32 %v1339_v56, %v359_v42  ;;  %v518_v60 = vadd.f32 %v1341_v57, %v358_v31  ;;  %v1627_v31 = vld [vmem:[#allocation7_spill] sm:$0xff] }
 0x1c4   :  { %v691_v41 = vmul.f32 %v1424_v12, %v1424_v12  ;;  %v690_v37 = vmul.f32 %v1426_v49, %v1426_v49  ;;  %v361_v26 = vadd.f32 %v1287_v9, %v201_v53  ;;  %v203_v33 = vadd.f32 %v878_v43, %v187_v30 }
 0x1c5   :  { %v637_v52 = vpop.permute.xlu0 %636  ;;  %v635_v62 = vpop.permute.xlu1 %634  ;;  %v360_v58 = vadd.f32 %v1289_v10, %v200_v7  ;;  %v882_v54 = vunpack.c.h.bf16 %v896_v50  ;;  %v189_v28 = vmul.f32 %v1618_v36, %v1127_v34  ;;  %v188_v9 = vmul.f32 %v1620_v1, %v1619_v17  ;;  %v1624_v34 = vld [vmem:[#allocation6_spill] sm:$0xff] }
 0x1c6   :  { %v1447_v55 = vadd.f32 %v637_v52, %v517_v39  ;;  %v1449_v15 = vadd.f32 %v635_v62, %v516_v40  ;;  %v715_v16 = vsel %vm702_vm0, %v690_v37, 0.0  ;;  %v718_v2 = vsel %vm702_vm0, %v691_v41, 0.0  ;;  %v1625_v39 = vld [vmem:[#allocation11_spill] sm:$0xff]  ;;  %v1626_v41 = vld [vmem:[#allocation12_spill] sm:$0xff] }
 0x1c7   :  { %716 = vadd.xlane.f32.xlu0 %v715_v16  ;;  %719 = vadd.xlane.f32.xlu1 %v718_v2  ;;  %v202_v3 = vadd.f32 %v877_v8, %v186_v32  ;;  %v881_v10 = vunpack.c.l.bf16 %v896_v50  ;;  %v521_v38 = vadd.f32 %v1621_v21, %v361_v26  ;;  %v520_v11 = vadd.f32 %v1622_v0, %v360_v58  ;;  %v1628_v52 = vld [vmem:[#allocation8_spill] sm:$0xff]  ;;  %v1629_v8 = vld [vmem:[#allocation13_spill] sm:$0xff] }
 0x1c8   :  { %v693_v35 = vmul.f32 %v1447_v55, %v1447_v55  ;;  %v692_v63 = vmul.f32 %v1449_v15, %v1449_v15  ;;  %v363_v18 = vadd.f32 %v1623_v29, %v203_v33  ;;  %v205_v13 = vadd.f32 %v882_v54, %v189_v28 }
 0x1c9   :  { %v641_v61 = vpop.permute.xlu0 %640  ;;  %v639_v27 = vpop.permute.xlu1 %638  ;;  %v362_v44 = vadd.f32 %v1624_v34, %v202_v3  ;;  %v204_v14 = vadd.f32 %v881_v10, %v188_v9 }
 0x1ca   :  { %v1463_v59 = vadd.f32 %v641_v61, %v519_v4  ;;  %v1465_v19 = vadd.f32 %v639_v27, %v518_v60  ;;  %v721_v56 = vsel %vm702_vm0, %v692_v63, 0.0  ;;  %v724_v57 = vsel %vm702_vm0, %v693_v35, 0.0  ;;  %v1630_v60 = vld [vmem:[#allocation14_spill] sm:$0xff] }
 0x1cb   :  { %722 = vadd.xlane.f32.xlu0 %v721_v56  ;;  %725 = vadd.xlane.f32.xlu1 %v724_v57  ;;  %v523_v40 = vadd.f32 %v1625_v39, %v363_v18  ;;  %v522_v37 = vadd.f32 %v1626_v41, %v362_v44  ;;  %v365_v43 = vadd.f32 %v1627_v31, %v205_v13 }
 0x1cc   :  { %v695_v20 = vmul.f32 %v1463_v59, %v1463_v59  ;;  %v694_v22 = vmul.f32 %v1465_v19, %v1465_v19  ;;  %v364_v62 = vadd.f32 %v1628_v52, %v204_v14 }
 0x1cd   :  { %v645_v45 = vpop.permute.xlu0 %644  ;;  %v643_v48 = vpop.permute.xlu1 %642  ;;  %v525_v4 = vadd.f32 %v1629_v8, %v365_v43 }
 0x1ce   :  { %v1481_v24 = vadd.f32 %v645_v45, %v521_v38  ;;  %v1483_v51 = vadd.f32 %v643_v48, %v520_v11  ;;  %v727_v5 = vsel %vm702_vm0, %v694_v22, 0.0  ;;  %v730_v6 = vsel %vm702_vm0, %v695_v20, 0.0 }
 0x1cf   :  { %728 = vadd.xlane.f32.xlu0 %v727_v5  ;;  %731 = vadd.xlane.f32.xlu1 %v730_v6  ;;  %v524_v35 = vadd.f32 %v1630_v60, %v364_v62 }
 0x1d0   :  { %v697_v30 = vmul.f32 %v1481_v24, %v1481_v24  ;;  %v696_v42 = vmul.f32 %v1483_v51, %v1483_v51 }
 0x1d1   :  { %v649_v50 = vpop.permute.xlu0 %648  ;;  %v647_v16 = vpop.permute.xlu1 %646 }
 0x1d2   :  { %v1495_v2 = vadd.f32 %v649_v50, %v523_v40  ;;  %v1497_v32 = vadd.f32 %v647_v16, %v522_v37  ;;  %v733_v53 = vsel %vm702_vm0, %v696_v42, 0.0  ;;  %v736_v7 = vsel %vm702_vm0, %v697_v30, 0.0 }
 0x1d3   :  { %734 = vadd.xlane.f32.xlu0 %v733_v53  ;;  %737 = vadd.xlane.f32.xlu1 %v736_v7 }
 0x1d4   :  { %v699_v63 = vmul.f32 %v1495_v2, %v1495_v2  ;;  %v698_v26 = vmul.f32 %v1497_v32, %v1497_v32 }
 0x1d5   :  { %v653_v58 = vpop.permute.xlu0 %652  ;;  %v651_v33 = vpop.permute.xlu1 %650 }
 0x1d6   :  { %v1507_v54 = vadd.f32 %v653_v58, %v525_v4  ;;  %v1509_v61 = vadd.f32 %v651_v33, %v524_v35  ;;  %v739_v27 = vsel %vm702_vm0, %v698_v26, 0.0  ;;  %v742_v56 = vsel %vm702_vm0, %v699_v63, 0.0 }
 0x1d7   :  { %740 = vadd.xlane.f32.xlu0 %v739_v27  ;;  %743 = vadd.xlane.f32.xlu1 %v742_v56 }
 0x1d8   :  { %v701_v57 = vmul.f32 %v1507_v54, %v1507_v54  ;;  %v700_v36 = vmul.f32 %v1509_v61, %v1509_v61 }
 0x1da   :  { %v745_v28 = vsel %vm702_vm0, %v700_v36, 0.0  ;;  %v748_v17 = vsel %vm702_vm0, %v701_v57, 0.0 }
 0x1db   :  { %746 = vadd.xlane.f32.xlu0 %v745_v28  ;;  %749 = vadd.xlane.f32.xlu1 %v748_v17 }
 0x24c   :  { %v708_v1 = vpop.xlane.xlu0 %707  ;;  %v705_v9 = vpop.xlane.xlu1 %704 }
 0x24d   :  { %v752_v3 = vmax.f32 %v708_v1, 1e-24  ;;  %v751_v10 = vmax.f32 %v705_v9, 1e-24 }
 0x24f   :  { %912 = vrsqrt.f32 %v752_v3 }
 0x250   :  { %914 = vrsqrt.f32 %v751_v10  ;;  %v711_v21 = vpop.xlane.xlu0 %710  ;;  %v714_v38 = vpop.xlane.xlu1 %713 }
 0x251   :  { %v753_v0 = vmax.f32 %v711_v21, 1e-24  ;;  %v754_v11 = vmax.f32 %v714_v38, 1e-24 }
 0x253   :  { %916 = vrsqrt.f32 %v753_v0 }
 0x254   :  { %918 = vrsqrt.f32 %v754_v11  ;;  %v717_v20 = vpop.xlane.xlu0 %716  ;;  %v720_v22 = vpop.xlane.xlu1 %719 }
 0x255   :  { %v755_v29 = vmax.f32 %v717_v20, 1e-24  ;;  %v756_v18 = vmax.f32 %v720_v22, 1e-24 }
 0x257   :  { %920 = vrsqrt.f32 %v755_v29 }
 0x258   :  { %922 = vrsqrt.f32 %v756_v18  ;;  %v723_v34 = vpop.xlane.xlu0 %722  ;;  %v726_v44 = vpop.xlane.xlu1 %725 }
 0x259   :  { %v913_v45 = vpop.eup %912  ;;  %v757_v48 = vmax.f32 %v723_v34, 1e-24  ;;  %v758_v5 = vmax.f32 %v726_v44, 1e-24 }
 0x25a   :  { %v915_v6 = vpop.eup %914  ;;  %v784_v13 = vmul.f32 %v913_v45, %v1386_v23 }
 0x25b   :  { %v783_v14 = vmul.f32 %v915_v6, %v1388_v25  ;;  %924 = vrsqrt.f32 %v757_v48 }
 0x25c   :  { %800 = vst.msk [vmem:[%s1602_s3 + $0x8] sm:$0xff] %vm702_vm0, %v784_v13  ;;  %926 = vrsqrt.f32 %v758_v5  ;;  %v729_v39 = vpop.xlane.xlu0 %728  ;;  %v732_v40 = vpop.xlane.xlu1 %731 }
 0x25d   :  { %v917_v41 = vpop.eup %916  ;;  %799 = vst.msk [vmem:[%s1602_s3] sm:$0xff] %vm702_vm0, %v783_v14  ;;  %v759_v37 = vmax.f32 %v729_v39, 1e-24  ;;  %v760_v30 = vmax.f32 %v732_v40, 1e-24 }
 0x25e   :  { %v919_v23 = vpop.eup %918  ;;  %v785_v25 = vmul.f32 %v917_v41, %v1407_v47 }
 0x25f   :  { %v786_v42 = vmul.f32 %v919_v23, %v1405_v46  ;;  %928 = vrsqrt.f32 %v759_v37 }
 0x260   :  { %801 = vst.msk [vmem:[%s1602_s3 + $0x10] sm:$0xff] %vm702_vm0, %v785_v25  ;;  %930 = vrsqrt.f32 %v760_v30  ;;  %v735_v31 = vpop.xlane.xlu0 %734  ;;  %v738_v43 = vpop.xlane.xlu1 %737 }
 0x261   :  { %v921_v52 = vpop.eup %920  ;;  %802 = vst.msk [vmem:[%s1602_s3 + $0x18] sm:$0xff] %vm702_vm0, %v786_v42  ;;  %v761_v62 = vmax.f32 %v735_v31, 1e-24  ;;  %v762_v50 = vmax.f32 %v738_v43, 1e-24 }
 0x262   :  { %v923_v47 = vpop.eup %922  ;;  %v787_v46 = vmul.f32 %v921_v52, %v1426_v49 }
 0x263   :  { %v788_v16 = vmul.f32 %v923_v47, %v1424_v12  ;;  %932 = vrsqrt.f32 %v761_v62 }
 0x264   :  { %803 = vst.msk [vmem:[%s1602_s3 + $0x20] sm:$0xff] %vm702_vm0, %v787_v46  ;;  %934 = vrsqrt.f32 %v762_v50  ;;  %v741_v53 = vpop.xlane.xlu0 %740  ;;  %v744_v7 = vpop.xlane.xlu1 %743 }
 0x265   :  { %v925_v8 = vpop.eup %924  ;;  %804 = vst.msk [vmem:[%s1602_s3 + $0x28] sm:$0xff] %vm702_vm0, %v788_v16  ;;  %v763_v4 = vmax.f32 %v741_v53, 1e-24  ;;  %v764_v60 = vmax.f32 %v744_v7, 1e-24 }
 0x266   :  { %v927_v49 = vpop.eup %926  ;;  %v789_v12 = vmul.f32 %v925_v8, %v1449_v15 }
 0x267   :  { %v790_v35 = vmul.f32 %v927_v49, %v1447_v55  ;;  %936 = vrsqrt.f32 %v763_v4 }
 0x268   :  { %805 = vst.msk [vmem:[%s1602_s3 + $0x30] sm:$0xff] %vm702_vm0, %v789_v12  ;;  %938 = vrsqrt.f32 %v764_v60  ;;  %v747_v63 = vpop.xlane.xlu0 %746  ;;  %v750_v26 = vpop.xlane.xlu1 %749 }
 0x269   :  { %v929_v58 = vpop.eup %928  ;;  %806 = vst.msk [vmem:[%s1602_s3 + $0x38] sm:$0xff] %vm702_vm0, %v790_v35  ;;  %v765_v33 = vmax.f32 %v747_v63, 1e-24  ;;  %v766_v27 = vmax.f32 %v750_v26, 1e-24 }
 0x26a   :  { %v931_v15 = vpop.eup %930  ;;  %v791_v55 = vmul.f32 %v929_v58, %v1465_v19 }
 0x26b   :  { %v792_v56 = vmul.f32 %v931_v15, %v1463_v59  ;;  %940 = vrsqrt.f32 %v765_v33 }
 0x26c   :  { %807 = vst.msk [vmem:[%s1602_s3 + $0x40] sm:$0xff] %vm702_vm0, %v791_v55  ;;  %942 = vrsqrt.f32 %v766_v27 }
 0x26d   :  { %v933_v57 = vpop.eup %932  ;;  %808 = vst.msk [vmem:[%s1602_s3 + $0x48] sm:$0xff] %vm702_vm0, %v792_v56 }
 0x26e   :  { %v935_v36 = vpop.eup %934  ;;  %v793_v28 = vmul.f32 %v933_v57, %v1483_v51 }
 0x26f   :  { %v794_v19 = vmul.f32 %v935_v36, %v1481_v24 }
 0x270   :  { %809 = vst.msk [vmem:[%s1602_s3 + $0x50] sm:$0xff] %vm702_vm0, %v793_v28 }
 0x271   :  { %v937_v59 = vpop.eup %936  ;;  %810 = vst.msk [vmem:[%s1602_s3 + $0x58] sm:$0xff] %vm702_vm0, %v794_v19 }
 0x272   :  { %v939_v17 = vpop.eup %938  ;;  %v795_v1 = vmul.f32 %v937_v59, %v1497_v32 }
 0x273   :  { %v796_v9 = vmul.f32 %v939_v17, %v1495_v2 }
 0x274   :  { %811 = vst.msk [vmem:[%s1602_s3 + $0x60] sm:$0xff] %vm702_vm0, %v795_v1 }
 0x275   :  { %v941_v24 = vpop.eup %940  ;;  %812 = vst.msk [vmem:[%s1602_s3 + $0x68] sm:$0xff] %vm702_vm0, %v796_v9 }
 0x276   :  { %v943_v51 = vpop.eup %942  ;;  %v797_v3 = vmul.f32 %v941_v24, %v1509_v61 }
 0x277   :  { %v798_v10 = vmul.f32 %v943_v51, %v1507_v54 }
 0x278   :  { %813 = vst.msk [vmem:[%s1602_s3 + $0x70] sm:$0xff] %vm702_vm0, %v797_v3 }
 0x279   :  { %814 = vst.msk [vmem:[%s1602_s3 + $0x78] sm:$0xff] %vm702_vm0, %v798_v10 }

</bundles_post_ra>
